<compile_context>
chip_gen: v5e
topology: v5e:2x2
jax: 0.10.0
libtpu: 0.0.40
codegen_flags: <defaults>
</compile_context>

<pallas_src>
import jax
import jax.numpy as jnp
from jax.experimental import pallas as pl
from jax.experimental.pallas import tpu as pltpu


def _round_up(x, m):
    return ((x + m - 1) // m) * m


def _make_convblock_kernel(W, L):
    """Kernel over one block: (Cin_p, L) -> (Cout_p, L), L = imgs_per_block*H*W."""
    taps = [(ky - 1, kx - 1) for ky in range(3) for kx in range(3)]

    def kernel(x_ref, w1_ref, b1_ref, m1_ref, w2_ref, b2_ref, m2_ref, o_ref):
        # x_ref : (1, Cin_p, L)          flattened, channel-padded images
        # w1_ref: (Cout_p, 9*Cin_p)      rows ordered (ky, kx, cin)
        # b1_ref: (Cout_p, 1)
        # m1_ref: (9*Cin_p, L)           precomputed 0/1 halo mask for conv1 slab
        # w2_ref: (Cout_p, 9*Cout_p)
        # b2_ref: (Cout_p, 1)
        # m2_ref: (9*Cout_p, L)
        # o_ref : (1, Cout_p, L)

        def conv3x3_relu(act, w_ref, b_ref, m_ref):
            # act: (C_p, L) f32  ->  (Cout_p, L) f32
            rows = []
            for dy, dx in taps:
                d = dy * W + dx
                shifted = act if d == 0 else pltpu.roll(act, shift=(-d) % L, axis=1)
                rows.append(shifted)
            # Sublane-aligned stack (each chunk is C_p = multiple of 8 rows),
            # then one elementwise multiply with the precomputed halo mask.
            slab = jnp.concatenate(rows, axis=0) * m_ref[...]      # (9*C_p, L)
            out = jnp.dot(w_ref[...], slab,
                          preferred_element_type=jnp.float32)       # (Cout_p, L)
            return jnp.maximum(out + b_ref[...], 0.0)                # bias + ReLU

        x = x_ref[0].astype(jnp.float32)                             # (Cin_p, L)
        a1 = conv3x3_relu(x, w1_ref, b1_ref, m1_ref)
        a2 = conv3x3_relu(a1, w2_ref, b2_ref, m2_ref)
        o_ref[...] = a2[None, :, :].astype(o_ref.dtype)

    return kernel


def conv_block(x_nchw, w1, b1, w2, b2):
    """ConvBlock forward.

    x_nchw : (N, Cin, H, W)              float32
    w1     : (Cout, Cin, 3, 3),  b1: (Cout,)
    w2     : (Cout, Cout, 3, 3), b2: (Cout,)
    returns: (N, Cout, H, W)             float32
    """
    N, Cin, H, W = x_nchw.shape
    Cout = w1.shape[0]
    HW = H * W

    Cin_p = _round_up(Cin, 8)
    Cout_p = _round_up(Cout, 8)

    # Keep >= 2 parallel grid steps when N >= 2 (v7x has 2 TensorCores); fuse the
    # remaining batch into the lane axis for fuller vregs (helps v5e/v6e too).
    if N >= 2 and N % 2 == 0:
        num_blocks = 2
    else:
        num_blocks = max(N, 1)
    imgs_per_block = N // num_blocks
    L = imgs_per_block * HW

    # --- wrapper-side (tiny) layout prep: pad channels, group images into lanes ---
    x_flat = x_nchw.reshape(N, Cin, HW).astype(jnp.float32)
    x_pad = jnp.pad(x_flat, ((0, 0), (0, Cin_p - Cin), (0, 0)))
    x_grp = (x_pad.reshape(num_blocks, imgs_per_block, Cin_p, HW)
                  .transpose(0, 2, 1, 3)
                  .reshape(num_blocks, Cin_p, L))

    # Weights -> (Cout_p, 9*C_p), row order (ky, kx, cin) matching the im2col slab.
    w1_p = jnp.zeros((Cout_p, Cin_p, 3, 3), jnp.float32).at[:Cout, :Cin].set(w1)
    w2_p = jnp.zeros((Cout_p, Cout_p, 3, 3), jnp.float32).at[:Cout, :Cout].set(w2)
    w1_k = jnp.transpose(w1_p, (0, 2, 3, 1)).reshape(Cout_p, 9 * Cin_p)
    w2_k = jnp.transpose(w2_p, (0, 2, 3, 1)).reshape(Cout_p, 9 * Cout_p)
    b1_k = jnp.zeros((Cout_p, 1), jnp.float32).at[:Cout, 0].set(b1)
    b2_k = jnp.zeros((Cout_p, 1), jnp.float32).at[:Cout, 0].set(b2)

    # Precomputed halo masks (hoisted out of the kernel). Roll wrap across row,
    # column and image boundaries is always zeroed by these masks.
    p = jnp.arange(L, dtype=jnp.int32)
    local = p % HW
    ii = local // W
    jj = local % W
    tap_masks = []
    for dy in (-1, 0, 1):
        for dx in (-1, 0, 1):
            ok = (ii + dy >= 0) & (ii + dy < H) & (jj + dx >= 0) & (jj + dx < W)
            tap_masks.append(ok)
    mask_tap = jnp.stack(tap_masks, axis=0).astype(jnp.float32)      # (9, L)
    m1 = jnp.repeat(mask_tap, Cin_p, axis=0)                          # (9*Cin_p, L)
    m2 = jnp.repeat(mask_tap, Cout_p, axis=0)                         # (9*Cout_p, L)

    kernel = _make_convblock_kernel(W, L)

    out_grp = pl.pallas_call(
        kernel,
        out_shape=jax.ShapeDtypeStruct((num_blocks, Cout_p, L), x_nchw.dtype),
        grid_spec=pltpu.PrefetchScalarGridSpec(
            num_scalar_prefetch=0,
            grid=(num_blocks,),
            in_specs=[
                pl.BlockSpec((1, Cin_p, L), lambda b: (b, 0, 0)),
                pl.BlockSpec((Cout_p, 9 * Cin_p), lambda b: (0, 0)),
                pl.BlockSpec((Cout_p, 1), lambda b: (0, 0)),
                pl.BlockSpec((9 * Cin_p, L), lambda b: (0, 0)),
                pl.BlockSpec((Cout_p, 9 * Cout_p), lambda b: (0, 0)),
                pl.BlockSpec((Cout_p, 1), lambda b: (0, 0)),
                pl.BlockSpec((9 * Cout_p, L), lambda b: (0, 0)),
            ],
            out_specs=pl.BlockSpec((1, Cout_p, L), lambda b: (b, 0, 0)),
        ),
        compiler_params=pltpu.CompilerParams(
            dimension_semantics=("parallel",),
            vmem_limit_bytes=32 * 1024 * 1024,  # buffers are tiny; safe on v5e/v6e/v7x
        ),
    )(x_grp, w1_k, b1_k, m1, w2_k, b2_k, m2)

    out = (out_grp.reshape(num_blocks, Cout_p, imgs_per_block, HW)
                  .transpose(0, 2, 1, 3)
                  .reshape(N, Cout_p, H, W))
    return out[:, :Cout]


def _reference(x_nchw, w1, b1, w2, b2):
    """Pure-JAX reference matching PyTorch Conv2d semantics (NCHW, OIHW)."""
    dn = jax.lax.conv_dimension_numbers(x_nchw.shape, w1.shape,
                                        ("NCHW", "OIHW", "NCHW"))
    y = jax.lax.conv_general_dilated(x_nchw, w1, (1, 1), "SAME",
                                     dimension_numbers=dn)
    y = jax.nn.relu(y + b1[None, :, None, None])
    dn2 = jax.lax.conv_dimension_numbers(y.shape, w2.shape,
                                         ("NCHW", "OIHW", "NCHW"))
    z = jax.lax.conv_general_dilated(y, w2, (1, 1), "SAME",
                                     dimension_numbers=dn2)
    return jax.nn.relu(z + b2[None, :, None, None])


if __name__ == "__main__":
    def run_case(N, Cin, Cout, H, W, seed):
        key = jax.random.PRNGKey(seed)
        k1, k2, k3, k4, k5 = jax.random.split(key, 5)
        x = jax.random.normal(k1, (N, Cin, H, W), dtype=jnp.float32)
        bound1 = 1.0 / (Cin * 9) ** 0.5
        w1 = jax.random.uniform(k2, (Cout, Cin, 3, 3), jnp.float32, -bound1, bound1)
        b1 = jax.random.uniform(k3, (Cout,), jnp.float32, -bound1, bound1)
        bound2 = 1.0 / (Cout * 9) ** 0.5
        w2 = jax.random.uniform(k4, (Cout, Cout, 3, 3), jnp.float32, -bound2, bound2)
        b2 = jax.random.uniform(k5, (Cout,), jnp.float32, -bound2, bound2)

        out = jax.block_until_ready(conv_block(x, w1, b1, w2, b2))
        ref = jax.block_until_ready(_reference(x, w1, b1, w2, b2))
        assert out.shape == (N, Cout, H, W)
        assert jnp.allclose(out, ref, atol=1e-5, rtol=1e-5), "mismatch vs reference"

    # Primary small-shape test (1 image per grid step, 2 parallel steps).
    run_case(2, 4, 8, 16, 16, 0)
    # Extra test exercising batch-into-lanes fusion (2 images fused per grid step),
    # including cross-image roll wrap being zeroed by the halo masks.
    run_case(4, 4, 8, 16, 16, 1)

    print("KERNEL_OK")
</pallas_src>

<mosaic_0001>
module attributes {stable_mosaic.version = 11 : i64} {
  func.func @kernel(%arg0: i32, %arg1: memref<1x8x256xf32, #tpu.memory_space<vmem>>, %arg2: memref<8x72xf32, #tpu.memory_space<vmem>>, %arg3: memref<8x1xf32, #tpu.memory_space<vmem>>, %arg4: memref<72x256xf32, #tpu.memory_space<vmem>>, %arg5: memref<8x72xf32, #tpu.memory_space<vmem>>, %arg6: memref<8x1xf32, #tpu.memory_space<vmem>>, %arg7: memref<72x256xf32, #tpu.memory_space<vmem>>, %arg8: memref<1x8x256xf32, #tpu.memory_space<vmem>>) attributes {dimension_semantics = [#tpu.dimension_semantics<parallel>], iteration_bounds = array<i64: 2>, scalar_prefetch = 0 : i64, scratch_operands = 0 : i64, tpu.core_type = #tpu.core_type<tc>, window_params = [{transform_indices = @transform_0, window_bounds = array<i64: 1, 8, 256>}, {pipeline_mode = #tpu.pipeline_mode<synchronous>, transform_indices = @transform_1, window_bounds = array<i64: 8, 72>}, {pipeline_mode = #tpu.pipeline_mode<synchronous>, transform_indices = @transform_2, window_bounds = array<i64: 8, 1>}, {pipeline_mode = #tpu.pipeline_mode<synchronous>, transform_indices = @transform_3, window_bounds = array<i64: 72, 256>}, {pipeline_mode = #tpu.pipeline_mode<synchronous>, transform_indices = @transform_4, window_bounds = array<i64: 8, 72>}, {pipeline_mode = #tpu.pipeline_mode<synchronous>, transform_indices = @transform_5, window_bounds = array<i64: 8, 1>}, {pipeline_mode = #tpu.pipeline_mode<synchronous>, transform_indices = @transform_6, window_bounds = array<i64: 72, 256>}, {transform_indices = @transform_7, window_bounds = array<i64: 1, 8, 256>}]} {
    %c0 = arith.constant 0 : index
    %c0_0 = arith.constant 0 : index
    %c0_1 = arith.constant 0 : index
    %0 = vector.load %arg1[%c0, %c0_0, %c0_1] : memref<1x8x256xf32, #tpu.memory_space<vmem>>, vector<1x8x256xf32>
    %1 = vector.shape_cast %0 : vector<1x8x256xf32> to vector<8x256xf32>
    %c17_i32 = arith.constant 17 : i32
    %2 = tpu.dynamic_rotate %1 by %c17_i32 dim 1 : vector<8x256xf32>, i32 -> vector<8x256xf32>
    %c16_i32 = arith.constant 16 : i32
    %3 = tpu.dynamic_rotate %1 by %c16_i32 dim 1 : vector<8x256xf32>, i32 -> vector<8x256xf32>
    %c15_i32 = arith.constant 15 : i32
    %4 = tpu.dynamic_rotate %1 by %c15_i32 dim 1 : vector<8x256xf32>, i32 -> vector<8x256xf32>
    %c1_i32 = arith.constant 1 : i32
    %5 = tpu.dynamic_rotate %1 by %c1_i32 dim 1 : vector<8x256xf32>, i32 -> vector<8x256xf32>
    %c255_i32 = arith.constant 255 : i32
    %6 = tpu.dynamic_rotate %1 by %c255_i32 dim 1 : vector<8x256xf32>, i32 -> vector<8x256xf32>
    %c241_i32 = arith.constant 241 : i32
    %7 = tpu.dynamic_rotate %1 by %c241_i32 dim 1 : vector<8x256xf32>, i32 -> vector<8x256xf32>
    %c240_i32 = arith.constant 240 : i32
    %8 = tpu.dynamic_rotate %1 by %c240_i32 dim 1 : vector<8x256xf32>, i32 -> vector<8x256xf32>
    %c239_i32 = arith.constant 239 : i32
    %9 = tpu.dynamic_rotate %1 by %c239_i32 dim 1 : vector<8x256xf32>, i32 -> vector<8x256xf32>
    %10 = tpu.concatenate %2, %3, %4, %5, %1, %6, %7, %8, %9 in 0 : vector<8x256xf32>, vector<8x256xf32>, vector<8x256xf32>, vector<8x256xf32>, vector<8x256xf32>, vector<8x256xf32>, vector<8x256xf32>, vector<8x256xf32>, vector<8x256xf32> -> vector<72x256xf32>
    %c0_2 = arith.constant 0 : index
    %c0_3 = arith.constant 0 : index
    %11 = vector.load %arg4[%c0_2, %c0_3] : memref<72x256xf32, #tpu.memory_space<vmem>>, vector<72x256xf32>
    %12 = arith.mulf %10, %11 : vector<72x256xf32>
    %c0_4 = arith.constant 0 : index
    %c0_5 = arith.constant 0 : index
    %13 = vector.load %arg2[%c0_4, %c0_5] : memref<8x72xf32, #tpu.memory_space<vmem>>, vector<8x72xf32>
    %cst = arith.constant dense<0.000000e+00> : vector<8x256xf32>
    %14 = tpu.matmul %13, %12, %cst {dimension_numbers = #tpu.dot_dimension_numbers<[1], [0], [0], [1], [0, 0, 1, 1], [], []>} : vector<8x72xf32>, vector<72x256xf32>, vector<8x256xf32> -> vector<8x256xf32>
    %c0_6 = arith.constant 0 : index
    %c0_7 = arith.constant 0 : index
    %15 = vector.load %arg3[%c0_6, %c0_7] : memref<8x1xf32, #tpu.memory_space<vmem>>, vector<8x1xf32>
    %16 = vector.broadcast %15 : vector<8x1xf32> to vector<8x256xf32>
    %17 = arith.addf %14, %16 : vector<8x256xf32>
    %cst_8 = arith.constant 0.000000e+00 : f32
    %18 = vector.broadcast %cst_8 : f32 to vector<8x256xf32>
    %19 = arith.maximumf %17, %18 : vector<8x256xf32>
    %c17_i32_9 = arith.constant 17 : i32
    %20 = tpu.dynamic_rotate %19 by %c17_i32_9 dim 1 : vector<8x256xf32>, i32 -> vector<8x256xf32>
    %c16_i32_10 = arith.constant 16 : i32
    %21 = tpu.dynamic_rotate %19 by %c16_i32_10 dim 1 : vector<8x256xf32>, i32 -> vector<8x256xf32>
    %c15_i32_11 = arith.constant 15 : i32
    %22 = tpu.dynamic_rotate %19 by %c15_i32_11 dim 1 : vector<8x256xf32>, i32 -> vector<8x256xf32>
    %c1_i32_12 = arith.constant 1 : i32
    %23 = tpu.dynamic_rotate %19 by %c1_i32_12 dim 1 : vector<8x256xf32>, i32 -> vector<8x256xf32>
    %c255_i32_13 = arith.constant 255 : i32
    %24 = tpu.dynamic_rotate %19 by %c255_i32_13 dim 1 : vector<8x256xf32>, i32 -> vector<8x256xf32>
    %c241_i32_14 = arith.constant 241 : i32
    %25 = tpu.dynamic_rotate %19 by %c241_i32_14 dim 1 : vector<8x256xf32>, i32 -> vector<8x256xf32>
    %c240_i32_15 = arith.constant 240 : i32
    %26 = tpu.dynamic_rotate %19 by %c240_i32_15 dim 1 : vector<8x256xf32>, i32 -> vector<8x256xf32>
    %c239_i32_16 = arith.constant 239 : i32
    %27 = tpu.dynamic_rotate %19 by %c239_i32_16 dim 1 : vector<8x256xf32>, i32 -> vector<8x256xf32>
    %28 = tpu.concatenate %20, %21, %22, %23, %19, %24, %25, %26, %27 in 0 : vector<8x256xf32>, vector<8x256xf32>, vector<8x256xf32>, vector<8x256xf32>, vector<8x256xf32>, vector<8x256xf32>, vector<8x256xf32>, vector<8x256xf32>, vector<8x256xf32> -> vector<72x256xf32>
    %c0_17 = arith.constant 0 : index
    %c0_18 = arith.constant 0 : index
    %29 = vector.load %arg7[%c0_17, %c0_18] : memref<72x256xf32, #tpu.memory_space<vmem>>, vector<72x256xf32>
    %30 = arith.mulf %28, %29 : vector<72x256xf32>
    %c0_19 = arith.constant 0 : index
    %c0_20 = arith.constant 0 : index
    %31 = vector.load %arg5[%c0_19, %c0_20] : memref<8x72xf32, #tpu.memory_space<vmem>>, vector<8x72xf32>
    %cst_21 = arith.constant dense<0.000000e+00> : vector<8x256xf32>
    %32 = tpu.matmul %31, %30, %cst_21 {dimension_numbers = #tpu.dot_dimension_numbers<[1], [0], [0], [1], [0, 0, 1, 1], [], []>} : vector<8x72xf32>, vector<72x256xf32>, vector<8x256xf32> -> vector<8x256xf32>
    %c0_22 = arith.constant 0 : index
    %c0_23 = arith.constant 0 : index
    %33 = vector.load %arg6[%c0_22, %c0_23] : memref<8x1xf32, #tpu.memory_space<vmem>>, vector<8x1xf32>
    %34 = vector.broadcast %33 : vector<8x1xf32> to vector<8x256xf32>
    %35 = arith.addf %32, %34 : vector<8x256xf32>
    %cst_24 = arith.constant 0.000000e+00 : f32
    %36 = vector.broadcast %cst_24 : f32 to vector<8x256xf32>
    %37 = arith.maximumf %35, %36 : vector<8x256xf32>
    %38 = vector.shape_cast %37 : vector<8x256xf32> to vector<1x8x256xf32>
    %c0_25 = arith.constant 0 : index
    %c0_26 = arith.constant 0 : index
    %c0_27 = arith.constant 0 : index
    %39 = vector.load %arg8[%c0_25, %c0_26, %c0_27] : memref<1x8x256xf32, #tpu.memory_space<vmem>>, vector<1x8x256xf32>
    tpu.vector_store %arg8[%c0_25, %c0_26, %c0_27], %38 {strides = array<i32>} : memref<1x8x256xf32, #tpu.memory_space<vmem>>, vector<1x8x256xf32>,
    return
  }
  func.func @transform_0(%arg0: i32) -> (i32, i32, i32) {
    %c0_i32 = arith.constant 0 : i32
    %c0_i32_0 = arith.constant 0 : i32
    %c0_i32_1 = arith.constant 0 : i32
    return %arg0, %c0_i32, %c0_i32_0 : i32, i32, i32
  }
  func.func @transform_1(%arg0: i32) -> (i32, i32) {
    %c0_i32 = arith.constant 0 : i32
    %c0_i32_0 = arith.constant 0 : i32
    %c0_i32_1 = arith.constant 0 : i32
    return %c0_i32, %c0_i32_0 : i32, i32
  }
  func.func @transform_2(%arg0: i32) -> (i32, i32) {
    %c0_i32 = arith.constant 0 : i32
    %c0_i32_0 = arith.constant 0 : i32
    %c0_i32_1 = arith.constant 0 : i32
    return %c0_i32, %c0_i32_0 : i32, i32
  }
  func.func @transform_3(%arg0: i32) -> (i32, i32) {
    %c0_i32 = arith.constant 0 : i32
    %c0_i32_0 = arith.constant 0 : i32
    %c0_i32_1 = arith.constant 0 : i32
    return %c0_i32, %c0_i32_0 : i32, i32
  }
  func.func @transform_4(%arg0: i32) -> (i32, i32) {
    %c0_i32 = arith.constant 0 : i32
    %c0_i32_0 = arith.constant 0 : i32
    %c0_i32_1 = arith.constant 0 : i32
    return %c0_i32, %c0_i32_0 : i32, i32
  }
  func.func @transform_5(%arg0: i32) -> (i32, i32) {
    %c0_i32 = arith.constant 0 : i32
    %c0_i32_0 = arith.constant 0 : i32
    %c0_i32_1 = arith.constant 0 : i32
    return %c0_i32, %c0_i32_0 : i32, i32
  }
  func.func @transform_6(%arg0: i32) -> (i32, i32) {
    %c0_i32 = arith.constant 0 : i32
    %c0_i32_0 = arith.constant 0 : i32
    %c0_i32_1 = arith.constant 0 : i32
    return %c0_i32, %c0_i32_0 : i32, i32
  }
  func.func @transform_7(%arg0: i32) -> (i32, i32, i32) {
    %c0_i32 = arith.constant 0 : i32
    %c0_i32_0 = arith.constant 0 : i32
    %c0_i32_1 = arith.constant 0 : i32
    return %arg0, %c0_i32, %c0_i32_0 : i32, i32, i32
  }
}

</mosaic_0001>

<bundles_post_ra>
// kernel: tpu_custom_call.1
= control target key start
LH: loop header
LB: loop body
LE: loop exit
PB: predicated region body
PF: predicated region fallthrough
CT: control target
= control target key end

     0   :  { %s1357_s0 = inlined_call_operand.hbm [shape: f32[2,8,256], index: 0, kind: input, shape index: {}]   ;;  %s1358_s1 = inlined_call_operand.vmem [shape: f32[8,72], index: 1, kind: input, shape index: {}]   ;;  %s1359_s2 = inlined_call_operand.vmem [shape: f32[8,1], index: 2, kind: input, shape index: {}]   ;;  %s1360_s3 = inlined_call_operand.hbm [shape: f32[72,256], index: 3, kind: input, shape index: {}]   ;;  %s1361_s4 = inlined_call_operand.vmem [shape: f32[8,72], index: 4, kind: input, shape index: {}]   ;;  %s1362_s5 = inlined_call_operand.vmem [shape: f32[8,1], index: 5, kind: input, shape index: {}]   ;;  %s1363_s6 = inlined_call_operand.hbm [shape: f32[72,256], index: 6, kind: input, shape index: {}]   ;;  %s1364_s7 = inlined_call_operand.hbm [shape: f32[2,8,256], index: 7, kind: output, shape index: {}]  }
   0x1   :  { %1365 = sst [smem:[#allocation12_spill]] %s1360_s3 }
   0x2   :  { %1366 = sst [smem:[#allocation13_spill]] %s1363_s6 }
   0x3   :  { %12 = vsyncpa [#allocation3], 0 }
   0x4   :  { %14 = vsyncpa [#allocation3 + $0x1], 0 }
   0x5   :  { %15 = vsyncpa [#allocation6], 0 }
   0x6   :  { %16 = vsyncpa [#allocation4], 0 }
   0x7   :  { %18 = vsyncpa [#allocation4 + $0x1], 0  ;;  %s1042_s24 = smov 0   ;;  %s1044_s25 = smov 0  }
   0x8   :  { %s1046_s26 = smov 0   ;;  %s1048_s27 = smov 0  }
   0x9 LB: > { %s1367_s3 = sld [smem:[#allocation12_spill]]  ;;  %s1066_s8 = sadd.s32 4294967295, %s987_s27   ;;  %s987_s27 = sphi %s1048_s27, %s1379_s27   ;;  %s983_s26 = sphi %s1046_s26, %s1378_s26   ;;  %s979_s25 = sphi %s1044_s25, %s1377_s25   ;;  %s975_s24 = sphi %s1042_s24, %s1376_s24  }
   0xa   : > { %p724_p0 = scmp.ge.s32.totalorder %s987_s27, 1  ;;  %p45_p1 = scmp.eq.s32.totalorder %s1066_s8, 0 }
   0xb   : > { %p207_p2 = scmp.lt.s32.totalorder %s987_s27, 3  ;;  %s989_s10 = smov [#allocation5]  }
   0xc   : > { %s226_s11 = sshll.u32 %s989_s10, 4  ;;  %s1369_s6 = sld [smem:[#allocation13_spill]]  ;;  %s227_s11 = int_to_ptr.vmem [resolvable:$true] %s226_s11 }
   0xd   : > { %p1071_p3 = pnand %p724_p0, %p207_p2  ;;  %s990_s15 = smov [#allocation7]  }
   0xe   : > { %s246_s16 = sshll.u32 %s990_s15, 4  ;;  %s991_s17 = smov 256   ;;  %s247_s16 = int_to_ptr.vmem [resolvable:$true] %s246_s16 }
   0xf   : > { %s224_s30 = sshll.u32 %s1367_s3, 4  ;;  %p759_p4 = pneg %p1071_p3  ;;  %s225_s30 = int_to_ptr.hbm [resolvable:$true] %s224_s30 }
  0x10   : > { %s992_s18 = smov 16   ;;  %s723_s19 = sadd.s32 4294967294, %s987_s27  }
  0x11   : > { %p760_p6 = pnand %p759_p4, %p45_p1  ;;  %s1085_s20 = sadd.s32 1, %s987_s27  }
  0x12   : > { %s244_s14 = sshll.u32 %s1369_s6, 4  ;;  %s28_s21 = ssub.s32 %s987_s27, %s1085_s20  ;;  %s245_s14 = int_to_ptr.hbm [resolvable:$true] %s244_s14 }
  0x13   : > { %762 = dma.hbm_to_vmem [thread:$0]  (!%p760_p6), %s225_s30, 2304, %s227_s11, [#allocation6], %s991_s17, %s991_s17, %s992_s18  }
  0x14   : > { %765 = dma.hbm_to_vmem [thread:$0]  (!%p760_p6), %s245_s14, 2304, %s247_s16, [#allocation6], %s991_s17, %s991_s17, %s992_s18  }
  0x15   : > { %s31_s22 = sadd.s32 1, %s983_s26  ;;  %p29_p7 = scmp.eq.s32.totalorder %s28_s21, 0 }
  0x16   : > { %p38_p8 = scmp.ne.s32.totalorder %s983_s26, %s979_s25  ;;  %p39_p9 = scmp.eq.s32.totalorder %s987_s27, 0 }
  0x17   : > { %p44_p10 = scmp.ne.s32.totalorder %s979_s25, %s975_s24  ;;  %p194_p13 = scmp.eq.s32.totalorder %s1066_s8, 1 }
  0x18   : > { %s1096_s23 = scalar_select %p29_p7, %s983_s26, %s31_s22  }
  0x19   : > { %p1098_p11 = por %p39_p9, %p38_p8  ;;  %p1104_p12 = por %p45_p1, %p44_p10 }
  0x1a   : > { %p200_p0 = scmp.eq.s32.totalorder %s723_s19, 1  ;;  %p776_p2 = scmp.lt.s32.totalorder %s987_s27, 2 }
  0x1b   : > { %s260_s30 = sand.u32 1, %s983_s26   ;;  %p1111_p4 = por %p194_p13, %p38_p8 }
  0x1c   : > { %p1115_p6 = por %p200_p0, %p44_p10  ;;  %s728_s12 = sshll.u32 %s260_s30, 4 }
  0x1d   : > { %s745_s13 = sshll.u32 %s987_s27, 4  ;;  %s264_s17 = scalar_lea.vmem [#allocation2], %s728_s12 }
  0x1e   : > { %s269_s16 = scalar_lea.hbm %s1357_s0, %s745_s13  ;;  %s273_s18 = sshll.u32 %s264_s17, 4  ;;  %s274_s18 = int_to_ptr.vmem [resolvable:$true] %s273_s18 }
  0x1f   : > { %s271_s21 = sshll.u32 %s269_s16, 4  ;;  %p1125_p7 = pnand %p776_p2, %p1098_p11  ;;  %s272_s21 = int_to_ptr.hbm [resolvable:$true] %s271_s21 }
  0x20   : > { %s261_s22 = scalar_lea.sflag [#allocation3], %s260_s30  ;;  %s887_s3 = sshra.s32 %s272_s21, 4  ;;  %s888_s3 = int_to_ptr.hbm [resolvable:$true] %s887_s3 }
  0x21   : > { %s889_s6 = scalar_lea.hbm %s888_s3, 16  ;;  %p891_p9 = pneg %p1125_p7 }
  0x22   : > { %p890_p8 = scmp.ne.s32.totalorder %s888_s3, %s889_s6  ;;  %s894_s14 = scalar_lea.hbm %s1357_s0, 32 }
  0x23   : > { %p895_p11 = scmp.lt.s32.totalorder %s888_s3, %s1357_s0  ;;  %p896_p0 = scmp.lt.s32.totalorder %s894_s14, %s889_s6 }
  0x24   : > { %p892_p10 = pnand %p891_p9, %p890_p8 }
  0x25   : > { %p897_p2 = por %p896_p0, %p895_p11 }
  0x26   : > { %p893_p13 = pneg %p892_p10 }
  0x28   : > { %p898_p5 = pnand %p897_p2, %p893_p13 }
  0x2a   : > { %901 = shalt.err (!%p898_p5)
}
  0x2b   : > { %769 = dma.hbm_to_vmem [thread:$0]  (!%p1125_p7), %s272_s21, 256, %s274_s18, %s261_s22  }
  0x2c   : > { %282 = sbr.rel (%p1071_p3) target bundleno = 635 (0x27b), region = 48  ;;  %s1142_s30 = sand.u32 (!%p1071_p3), 1, %s979_s25  }
  0x2d   : > { %s732_s16 = sshll.u32 (!%p1071_p3), %s1142_s30, 4  ;;  %s285_s17 = scalar_lea.sflag (!%p1071_p3), [#allocation3], %s1142_s30 }
  0x2e   : > { %s288_s3 = scalar_lea.vmem (!%p1071_p3), [#allocation2], %s732_s16 }
  0x31   : > { %962 = dma.done.wait (%p1104_p12), %s285_s17, 256  }
  0x32   : > { %964 = vsyncadd (%p1104_p12), %s285_s17, 4294967040 }
  0x33   : > { %966 = dma.done.wait (%p45_p1), [#allocation6], 4608  }
  0x34   : > { %968 = vsyncadd (%p45_p1), [#allocation6], 4294962688  ;;  %v1156_v0 = vld [vmem:[%s288_s3] sm:$0xff]  ;;  %s993_s6 = smov 112   ;;  %s994_s9 = smov 111   ;;  %v1164_v1 = vld [vmem:[%s288_s3 + $0x8] sm:$0xff]  ;;  %v336_v3 = vlaneseq }
  0x35   : > { %376 = vrot.lane.b32.xlu1 %v1156_v0, %s993_s6  ;;  %383 = vrot.lane.b32.xlu0 %v1156_v0, %s994_s9  ;;  %s995_s18 = smov 113   ;;  %s996_s29 = smov 127   ;;  %v406_v8 = vld [vmem:[#allocation5 + $0x80] sm:$0xff]  ;;  %v407_v9 = vld [vmem:[#allocation5 + $0x88] sm:$0xff]  ;;  %v404_v16 = vld [vmem:[#allocation5 + $0x70] sm:$0xff]  ;;  %v1001_v34 = vmov 0  }
  0x36   : > { %369 = vrot.lane.b32.xlu2 %v1156_v0, %s995_s18  ;;  %s997_s21 = smov 1   ;;  %s998_s19 = smov 15   ;;  %v1192_v6 = vand.u32 127, %v336_v3  ;;  %v405_v17 = vld [vmem:[#allocation5 + $0x78] sm:$0xff]  ;;  %v402_v22 = vld [vmem:[#allocation5 + $0x60] sm:$0xff]  ;;  %v403_v23 = vld [vmem:[#allocation5 + $0x68] sm:$0xff]  ;;  %825 = vset.pattern.permute.xlu1 %v1001_v34 }
  0x37   : > { %s999_s22 = smov 16   ;;  %s1000_s12 = smov 17   ;;  %v400_v29 = vld [vmem:[#allocation5 + $0x50] sm:$0xff]  ;;  %v427_v30 = vld [vmem:[%s1359_s2] sm:$0xff]  ;;  %v401_v31 = vld [vmem:[#allocation5 + $0x58] sm:$0xff]  ;;  %826 = vset.pattern.permute.xlu0 %v1001_v34  ;;  %vm433_vm8 = vcmask 588800  }
  0x38   : > { %vm380_vm0 = vcmp.lt.s32.totalorder %v1192_v6, 112  ;;  %vm387_vm1 = vcmp.lt.s32.totalorder %v1192_v6, 111  ;;  %vm373_vm2 = vcmp.lt.s32.totalorder %v1192_v6, 113  ;;  %vm366_vm3 = vcmp.lt.s32.totalorder %v1192_v6, 127  ;;  %v398_v32 = vld [vmem:[#allocation5 + $0x40] sm:$0xff]  ;;  %v399_v33 = vld [vmem:[#allocation5 + $0x48] sm:$0xff] }
  0x39   : > { %v416_v41 = vmul.f32 %v398_v32, %v1156_v0  ;;  %v417_v42 = vmul.f32 %v399_v33, %v1164_v1  ;;  %vm359_vm4 = vcmp.lt.s32.totalorder %v1192_v6, 1  ;;  %v396_v43 = vld [vmem:[#allocation5 + $0x30] sm:$0xff]  ;;  %vm352_vm5 = vcmp.lt.s32.totalorder %v1192_v6, 15  ;;  %v397_v45 = vld [vmem:[#allocation5 + $0x38] sm:$0xff]  ;;  %v394_v46 = vld [vmem:[#allocation5 + $0x20] sm:$0xff] }
  0x3a   : > { %v395_v47 = vld [vmem:[#allocation5 + $0x28] sm:$0xff]  ;;  %vm345_vm6 = vcmp.lt.s32.totalorder %v1192_v6, 16  ;;  %v392_v58 = vld [vmem:[#allocation5 + $0x10] sm:$0xff]  ;;  %v393_v59 = vld [vmem:[#allocation5 + $0x18] sm:$0xff]  ;;  %vm338_vm7 = vcmp.lt.s32.totalorder %v1192_v6, 17 }
  0x3b   : > { %v390_v3 = vld [vmem:[#allocation5] sm:$0xff] }
  0x3d   : > { %378 = vrot.lane.b32.xlu1 %v1164_v1, %s993_s6  ;;  %385 = vrot.lane.b32.xlu0 %v1164_v1, %s994_s9 }
  0x3e   : > { %371 = vrot.lane.b32.xlu2 %v1164_v1, %s995_s18 }
  0x45   : > { %364 = vrot.lane.b32.xlu1 %v1164_v1, %s996_s29  ;;  %362 = vrot.lane.b32.xlu0 %v1156_v0, %s996_s29 }
  0x46   : > { %355 = vrot.lane.b32.xlu2 %v1156_v0, %s997_s21 }
  0x4d   : > { %348 = vrot.lane.b32.xlu1 %v1156_v0, %s998_s19  ;;  %357 = vrot.lane.b32.xlu0 %v1164_v1, %s997_s21 }
  0x4e   : > { %350 = vrot.lane.b32.xlu2 %v1164_v1, %s998_s19 }
  0x55   : > { %343 = vrot.lane.b32.xlu1 %v1164_v1, %s999_s22  ;;  %341 = vrot.lane.b32.xlu0 %v1156_v0, %s999_s22 }
  0x56   : > { %332 = vrot.lane.b32.xlu2 %v1156_v0, %s1000_s12 }
  0x5d   : > { %334 = vrot.lane.b32.xlu0 %v1164_v1, %s1000_s12  ;;  %430 = vperm.xlu1 %825, %v427_v30   ;;  %v541_v30 = vld [vmem:[#allocation7 + $0x70] sm:$0xff] }
  0x90   : > { %v370_v2 = vpop.permute.xlu2 %369 }
  0x98   : > { %v372_v7 = vpop.permute.xlu2 %371 }
  0x99   : > { %v374_v20 = vsel %vm373_vm2, %v370_v2, %v372_v7  ;;  %v375_v21 = vsel %vm373_vm2, %v372_v7, %v370_v2 }
  0x9a   : > { %v420_v27 = vmul.f32 %v402_v22, %v374_v20  ;;  %v421_v28 = vmul.f32 %v403_v23, %v375_v21  ;;  %v543_v21 = vld [vmem:[#allocation7 + $0x80] sm:$0xff]  ;;  %v544_v22 = vld [vmem:[#allocation7 + $0x88] sm:$0xff] }
  0xa0   : > { %v356_v26 = vpop.permute.xlu2 %355 }
  0xa7   : > { %v377_v4 = vpop.permute.xlu1 %376  ;;  %v384_v5 = vpop.permute.xlu0 %383 }
  0xa8   : > { %v351_v44 = vpop.permute.xlu2 %350 }
  0xaf   : > { %v379_v10 = vpop.permute.xlu1 %378  ;;  %v386_v11 = vpop.permute.xlu0 %385 }
  0xb0   : > { %v381_v12 = vsel %vm380_vm0, %v377_v4, %v379_v10  ;;  %v382_v13 = vsel %vm380_vm0, %v379_v10, %v377_v4  ;;  %v388_v14 = vsel %vm387_vm1, %v384_v5, %v386_v11  ;;  %v389_v15 = vsel %vm387_vm1, %v386_v11, %v384_v5  ;;  %v333_v2 = vpop.permute.xlu2 %332  ;;  %v391_v4 = vld [vmem:[#allocation5 + $0x8] sm:$0xff]  ;;  %v426_v11 = vld [vmem:[%s1358_s1] sm:$0xff] }
  0xb1   : > { %v424_v18 = vmul.f32 %v406_v8, %v388_v14  ;;  %v425_v19 = vmul.f32 %v407_v9, %v389_v15  ;;  %v422_v24 = vmul.f32 %v404_v16, %v381_v12  ;;  %v423_v25 = vmul.f32 %v405_v17, %v382_v13 }
  0xb3   : > { %444 = vmatpush.msra.mxu0 %v424_v18  ;;  %464 = vmatpush.msra.mxu1 %v425_v19 }
  0xb5   : > { %445 = vmatpush.msra.mxu0 %v422_v24  ;;  %465 = vmatpush.msra.mxu1 %v423_v25 }
  0xb7   : > { %v365_v35 = vpop.permute.xlu1 %364  ;;  %446 = vmatpush.msra.mxu0 %v420_v27  ;;  %466 = vmatpush.msra.mxu1 %v421_v28  ;;  %v363_v36 = vpop.permute.xlu0 %362 }
  0xb8   : > { %v367_v37 = vsel %vm366_vm3, %v363_v36, %v365_v35  ;;  %v368_v38 = vsel %vm366_vm3, %v365_v35, %v363_v36  ;;  %v539_v36 = vld [vmem:[#allocation7 + $0x60] sm:$0xff] }
  0xb9   : > { %v418_v39 = vmul.f32 %v400_v29, %v367_v37  ;;  %v419_v40 = vmul.f32 %v401_v31, %v368_v38  ;;  %v542_v31 = vld [vmem:[#allocation7 + $0x78] sm:$0xff]  ;;  %v540_v37 = vld [vmem:[#allocation7 + $0x68] sm:$0xff]  ;;  %v564_v38 = vld [vmem:[%s1362_s5] sm:$0xff] }
  0xbb   : > { %447 = vmatpush.msra.mxu0 %v418_v39  ;;  %467 = vmatpush.msra.mxu1 %v419_v40 }
  0xbd   : > { %448 = vmatpush.msra.mxu0 %v416_v41  ;;  %468 = vmatpush.msra.mxu1 %v417_v42 }
  0xbf   : > { %v349_v48 = vpop.permute.xlu1 %348  ;;  %v358_v49 = vpop.permute.xlu0 %357 }
  0xc0   : > { %v360_v50 = vsel %vm359_vm4, %v356_v26, %v358_v49  ;;  %v361_v51 = vsel %vm359_vm4, %v358_v49, %v356_v26  ;;  %v353_v52 = vsel %vm352_vm5, %v349_v48, %v351_v44  ;;  %v354_v53 = vsel %vm352_vm5, %v351_v44, %v349_v48 }
  0xc1   : > { %v414_v54 = vmul.f32 %v396_v43, %v361_v51  ;;  %v415_v55 = vmul.f32 %v397_v45, %v360_v50  ;;  %v412_v56 = vmul.f32 %v394_v46, %v354_v53  ;;  %v413_v57 = vmul.f32 %v395_v47, %v353_v52  ;;  %v537_v46 = vld [vmem:[#allocation7 + $0x50] sm:$0xff]  ;;  %v538_v47 = vld [vmem:[#allocation7 + $0x58] sm:$0xff]  ;;  %v535_v52 = vld [vmem:[#allocation7 + $0x40] sm:$0xff] }
  0xc2   : > { %v536_v53 = vld [vmem:[#allocation7 + $0x48] sm:$0xff] }
  0xc3   : > { %449 = vmatpush.msra.mxu0 %v414_v54  ;;  %469 = vmatpush.msra.mxu1 %v415_v55 }
  0xc5   : > { %450 = vmatpush.msra.mxu0 %v412_v56  ;;  %470 = vmatpush.msra.mxu1 %v413_v57 }
  0xc7   : > { %v344_v60 = vpop.permute.xlu1 %343  ;;  %v342_v61 = vpop.permute.xlu0 %341 }
  0xc8   : > { %v346_v62 = vsel %vm345_vm6, %v342_v61, %v344_v60  ;;  %v347_v63 = vsel %vm345_vm6, %v344_v60, %v342_v61 }
  0xc9   : > { %v410_v0 = vmul.f32 %v392_v58, %v347_v63  ;;  %v411_v1 = vmul.f32 %v393_v59, %v346_v62  ;;  %v533_v58 = vld [vmem:[#allocation7 + $0x30] sm:$0xff]  ;;  %v534_v59 = vld [vmem:[#allocation7 + $0x38] sm:$0xff] }
  0xcb   : > { %451 = vmatpush.msra.mxu0 %v410_v0  ;;  %471 = vmatpush.msra.mxu1 %v411_v1  ;;  %v531_v1 = vld [vmem:[#allocation7 + $0x20] sm:$0xff] }
  0xcf   : > { %v335_v5 = vpop.permute.xlu0 %334  ;;  %v431_v12 = vpop.permute.xlu1 %430 }
  0xd0   : > { %v339_v7 = vsel %vm338_vm7, %v333_v2, %v335_v5  ;;  %v340_v8 = vsel %vm338_vm7, %v335_v5, %v333_v2  ;;  %v532_v2 = vld [vmem:[#allocation7 + $0x28] sm:$0xff] }
  0xd1   : > { %v408_v9 = vmul.f32 %v390_v3, %v340_v8  ;;  %v409_v10 = vmul.f32 %v391_v4, %v339_v7 }
  0xd3   : > { %452 = vmatpush.msra.mxu0 %v408_v9  ;;  %472 = vmatpush.msra.mxu1 %v409_v10 }
  0xd4   : > { %736 = vmatmul.msk.f32.vlgmr.msra.gmra.mxu0 %vm433_vm8, %v426_v11  ;;  %737 = vmatmul.msk.f32.vlgmr.msra.gmra.mxu1 %vm433_vm8, %v426_v11  ;;  %v529_v11 = vld [vmem:[#allocation7 + $0x10] sm:$0xff] }
 0x151   : > { %v454_v13 = vpop.f32.mrf.mxu0  ;;  %v474_v14 = vpop.f32.mrf.mxu1 }
 0x152   : > { %v455_v15 = vadd.f32 %v454_v13, %v431_v12  ;;  %v475_v16 = vadd.f32 %v474_v14, %v431_v12  ;;  %v530_v12 = vld [vmem:[#allocation7 + $0x18] sm:$0xff] }
 0x154   : > { %v1244_v17 = vmax.f32 %v455_v15, 0.0  ;;  %v1246_v18 = vmax.f32 %v475_v16, 0.0 }
 0x156   : > { %523 = vrot.lane.b32.xlu0 %v1246_v18, %s994_s9  ;;  %515 = vrot.lane.b32.xlu1 %v1244_v17, %s993_s6  ;;  %v553_v60 = vmul.f32 %v535_v52, %v1244_v17  ;;  %v554_v61 = vmul.f32 %v536_v53, %v1246_v18 }
 0x157   : > { %521 = vrot.lane.b32.xlu2 %v1244_v17, %s994_s9 }
 0x15e   : > { %509 = vrot.lane.b32.xlu0 %v1244_v17, %s995_s18  ;;  %511 = vrot.lane.b32.xlu1 %v1246_v18, %s995_s18  ;;  %s746_s18 = sshll.u32 %s1066_s8, 4  ;;  %s618_s8 = scalar_lea.sflag [#allocation4], %s1142_s30 }
 0x15f   : > { %517 = vrot.lane.b32.xlu2 %v1246_v18, %s993_s6 }
 0x166   : > { %505 = vrot.lane.b32.xlu0 %v1246_v18, %s996_s29  ;;  %497 = vrot.lane.b32.xlu1 %v1244_v17, %s997_s21 }
 0x167   : > { %503 = vrot.lane.b32.xlu2 %v1244_v17, %s996_s29 }
 0x16e   : > { %491 = vrot.lane.b32.xlu0 %v1244_v17, %s998_s19  ;;  %493 = vrot.lane.b32.xlu1 %v1246_v18, %s998_s19  ;;  %s629_s19 = scalar_lea.hbm %s1364_s7, %s746_s18 }
 0x16f   : > { %499 = vrot.lane.b32.xlu2 %v1246_v18, %s997_s21  ;;  %s633_s13 = sshll.u32 %s629_s19, 4  ;;  %s634_s13 = int_to_ptr.hbm [resolvable:$true] %s633_s13 }
 0x170   : > { %s931_s14 = sshra.s32 %s634_s13, 4  ;;  %s932_s14 = int_to_ptr.hbm [resolvable:$true] %s931_s14 }
 0x171   : > { %s933_s15 = scalar_lea.hbm %s932_s14, 16  ;;  %p938_p12 = scmp.lt.s32.totalorder %s932_s14, %s1364_s7 }
 0x172   : > { %p934_p1 = scmp.ne.s32.totalorder %s932_s14, %s933_s15 }
 0x174   : > { %p935_p3 = pnand %p934_p1, %p1111_p4 }
 0x176   : > { %487 = vrot.lane.b32.xlu0 %v1246_v18, %s999_s22  ;;  %479 = vrot.lane.b32.xlu1 %v1244_v17, %s1000_s12  ;;  %p936_p5 = pneg %p935_p3 }
 0x177   : > { %485 = vrot.lane.b32.xlu2 %v1244_v17, %s999_s22  ;;  %s329_s22 = scalar_lea.vmem [#allocation8], %s732_s16  ;;  %s937_s16 = scalar_lea.hbm %s1364_s7, 32 }
 0x178   : > { %p939_p7 = scmp.lt.s32.totalorder %s937_s16, %s933_s15 }
 0x17a   : > { %p940_p8 = por %p939_p7, %p938_p12 }
 0x17c   : > { %p941_p9 = pnand %p940_p8, %p936_p5 }
 0x17e   : > { %567 = vperm.xlu0 %826, %v564_v38  }
 0x17f   : > { %481 = vrot.lane.b32.xlu2 %v1246_v18, %s1000_s12  ;;  %s631_s12 = sshll.u32 %s329_s22, 4  ;;  %s632_s12 = int_to_ptr.vmem [resolvable:$true] %s631_s12 }
 0x1b1   : > { %v522_v19 = vpop.permute.xlu2 %521 }
 0x1b9   : > { %v518_v20 = vpop.permute.xlu2 %517 }
 0x1c1   : > { %v504_v25 = vpop.permute.xlu2 %503 }
 0x1c8   : > { %v524_v23 = vpop.permute.xlu0 %523  ;;  %v516_v24 = vpop.permute.xlu1 %515 }
 0x1c9   : > { %v519_v26 = vsel %vm380_vm0, %v516_v24, %v518_v20  ;;  %v520_v27 = vsel %vm380_vm0, %v518_v20, %v516_v24  ;;  %v525_v28 = vsel %vm387_vm1, %v522_v19, %v524_v23  ;;  %v526_v29 = vsel %vm387_vm1, %v524_v23, %v522_v19  ;;  %v500_v45 = vpop.permute.xlu2 %499  ;;  %v527_v19 = vld [vmem:[#allocation7] sm:$0xff]  ;;  %v528_v20 = vld [vmem:[#allocation7 + $0x8] sm:$0xff] }
 0x1ca   : > { %v561_v32 = vmul.f32 %v543_v21, %v525_v28  ;;  %v562_v33 = vmul.f32 %v544_v22, %v526_v29  ;;  %v559_v34 = vmul.f32 %v541_v30, %v519_v26  ;;  %v560_v35 = vmul.f32 %v542_v31, %v520_v27 }
 0x1cc   : > { %580 = vmatpush.msra.mxu2 %v561_v32  ;;  %600 = vmatpush.msra.mxu3 %v562_v33 }
 0x1ce   : > { %581 = vmatpush.msra.mxu2 %v559_v34  ;;  %601 = vmatpush.msra.mxu3 %v560_v35 }
 0x1d0   : > { %v510_v39 = vpop.permute.xlu0 %509  ;;  %v512_v40 = vpop.permute.xlu1 %511 }
 0x1d1   : > { %v513_v41 = vsel %vm373_vm2, %v510_v39, %v512_v40  ;;  %v514_v42 = vsel %vm373_vm2, %v512_v40, %v510_v39  ;;  %v486_v62 = vpop.permute.xlu2 %485 }
 0x1d2   : > { %v557_v43 = vmul.f32 %v539_v36, %v513_v41  ;;  %v558_v44 = vmul.f32 %v540_v37, %v514_v42 }
 0x1d4   : > { %582 = vmatpush.msra.mxu2 %v557_v43  ;;  %602 = vmatpush.msra.mxu3 %v558_v44 }
 0x1d8   : > { %v506_v48 = vpop.permute.xlu0 %505  ;;  %v498_v49 = vpop.permute.xlu1 %497 }
 0x1d9   : > { %v507_v50 = vsel %vm366_vm3, %v504_v25, %v506_v48  ;;  %v508_v51 = vsel %vm366_vm3, %v506_v48, %v504_v25  ;;  %v501_v56 = vsel %vm359_vm4, %v498_v49, %v500_v45  ;;  %v502_v57 = vsel %vm359_vm4, %v500_v45, %v498_v49  ;;  %v482_v10 = vpop.permute.xlu2 %481  ;;  %v563_v25 = vld [vmem:[%s1361_s4] sm:$0xff] }
 0x1da   : > { %v555_v54 = vmul.f32 %v537_v46, %v507_v50  ;;  %v556_v55 = vmul.f32 %v538_v47, %v508_v51  ;;  %v551_v63 = vmul.f32 %v533_v58, %v502_v57  ;;  %v552_v0 = vmul.f32 %v534_v59, %v501_v56 }
 0x1dc   : > { %583 = vmatpush.msra.mxu2 %v555_v54  ;;  %603 = vmatpush.msra.mxu3 %v556_v55 }
 0x1de   : > { %584 = vmatpush.msra.mxu2 %v553_v60  ;;  %604 = vmatpush.msra.mxu3 %v554_v61 }
 0x1e0   : > { %v492_v3 = vpop.permute.xlu0 %491  ;;  %v494_v4 = vpop.permute.xlu1 %493  ;;  %585 = vmatpush.msra.mxu2 %v551_v63  ;;  %605 = vmatpush.msra.mxu3 %v552_v0 }
 0x1e1   : > { %v495_v5 = vsel %vm352_vm5, %v492_v3, %v494_v4  ;;  %v496_v7 = vsel %vm352_vm5, %v494_v4, %v492_v3 }
 0x1e2   : > { %v549_v8 = vmul.f32 %v531_v1, %v496_v7  ;;  %v550_v9 = vmul.f32 %v532_v2, %v495_v5 }
 0x1e4   : > { %586 = vmatpush.msra.mxu2 %v549_v8  ;;  %606 = vmatpush.msra.mxu3 %v550_v9 }
 0x1e8   : > { %v488_v13 = vpop.permute.xlu0 %487  ;;  %v480_v14 = vpop.permute.xlu1 %479 }
 0x1e9   : > { %v489_v15 = vsel %vm345_vm6, %v486_v62, %v488_v13  ;;  %v490_v16 = vsel %vm345_vm6, %v488_v13, %v486_v62  ;;  %v483_v17 = vsel %vm338_vm7, %v480_v14, %v482_v10  ;;  %v484_v18 = vsel %vm338_vm7, %v482_v10, %v480_v14 }
 0x1ea   : > { %v547_v21 = vmul.f32 %v529_v11, %v490_v16  ;;  %v548_v22 = vmul.f32 %v530_v12, %v489_v15  ;;  %v545_v23 = vmul.f32 %v527_v19, %v484_v18  ;;  %v546_v24 = vmul.f32 %v528_v20, %v483_v17 }
 0x1ec   : > { %587 = vmatpush.msra.mxu2 %v547_v21  ;;  %607 = vmatpush.msra.mxu3 %v548_v22 }
 0x1ee   : > { %588 = vmatpush.msra.mxu2 %v545_v23  ;;  %608 = vmatpush.msra.mxu3 %v546_v24 }
 0x1ef   : > { %738 = vmatmul.msk.f32.vlgmr.msra.gmra.mxu2 %vm433_vm8, %v563_v25  ;;  %739 = vmatmul.msk.f32.vlgmr.msra.gmra.mxu3 %vm433_vm8, %v563_v25 }
 0x1f0   : > { %v568_v6 = vpop.permute.xlu0 %567 }
 0x272   : > { %v590_v26 = vpop.f32.mrf.mxu2  ;;  %v610_v27 = vpop.f32.mrf.mxu3 }
 0x273   : > { %v591_v28 = vadd.f32 %v590_v26, %v568_v6  ;;  %v611_v29 = vadd.f32 %v610_v27, %v568_v6 }
 0x275   : > { %v613_v30 = vmax.f32 %v591_v28, 0.0  ;;  %v614_v31 = vmax.f32 %v611_v29, 0.0 }
 0x277   : > { %615 = vst [vmem:[%s329_s22] sm:$0xff] %v613_v30 }
 0x278   : > { %616 = vst [vmem:[%s329_s22 + $0x8] sm:$0xff] %v614_v31 }
 0x279   : > { %944 = shalt.err (!%p941_p9)
}
 0x27a   : > { %757 = dma.vmem_to_hbm [thread:$0]  (%p1111_p4), %s632_s12, 256, %s634_s13, %s618_s8  }
 0x27b PF: > { %s645_s30 = sand.u32 1, %s975_s24   ;;  %p1375_p10 = scmp.ge.s32.totalorder %s987_s27, 2 }
 0x27c   : > { %s646_s9 = scalar_lea.sflag [#allocation4], %s645_s30 }
 0x27d   : > { %p771_p13 = pnand %p1375_p10, %p1115_p6 }
 0x27f   : > { %p772_p11 = pneg %p771_p13 }
 0x281   : > { %970 = dma.done.wait (%p772_p11), %s646_s9, 256  }
 0x282   : > { %972 = vsyncadd (%p772_p11), %s646_s9, 4294967040  ;;  %p21_p0 = scmp.ge.s32.totalorder %s1085_s20, 4   ;;  %s1376_s24 = smov %s979_s25 }
 0x283   : > { %s1377_s25 = smov %s983_s26  ;;  %s1378_s26 = smov %s1096_s23 }
 0x284   : > { %s1379_s27 = smov %s1085_s20  ;;  %23 = sbr.rel (!%p21_p0) target bundleno = 9 (0x9), region = 101 }
 0x289   :  { %652 = vsyncpa [#allocation3], 1 }
 0x28a   :  { %654 = vsyncpa [#allocation3 + $0x1], 1 }
 0x28b   :  { %655 = vsyncpa [#allocation6], 1 }
 0x28c   :  { %656 = vsyncpa [#allocation4], 1 }
 0x28d   :  { %658 = vsyncpa [#allocation4 + $0x1], 1 }

</bundles_post_ra>
